<compile_context>
chip_gen: v7x
topology: tpu7x:2x2x1
jax: 0.10.0
libtpu: 0.0.40
codegen_flags: <defaults>
</compile_context>

<pallas_src>
import math

import jax
import jax.numpy as jnp
from jax.experimental import pallas as pl
from jax.experimental.pallas import tpu as pltpu


def _round_up(x: int, m: int) -> int:
    return ((x + m - 1) // m) * m


def _expand_kernel(t_ref, w_ref, inv_ref, o_ref):
    # t_ref:   (3P, TILE_M) bf16 -- positions, exactly split into 3 bf16 chunks, transposed.
    # w_ref:   (3P, LANES)  bf16 -- block-diagonal 0/1 one-hot expansion matrix (tiled 3x).
    # inv_ref: (1, LANES)   f32  -- inv_freq repeated r=2 and tiled across the P position slots.
    # o_ref:   (TILE_M, LANES) f32 -- lane-dense output rows (unmasked 128-lane stores).
    #
    # One default-precision bf16 matmul (contraction over 3P, usually <= one MXU K-tile)
    # both moves positions lane->sublane and reconstructs t exactly in f32:
    #   t_exp[m, p*dim + d] = t0[p,m] + t1[p,m] + t2[p,m] = t[m*P + p]   (exact)
    t_exp = jax.lax.dot_general(
        t_ref[...], w_ref[...],
        dimension_numbers=(((0,), (0,)), ((), ())),
        preferred_element_type=jnp.float32,
    )
    o_ref[...] = t_exp * inv_ref[...]        # exact f32 product on the VPU


def _bcast_kernel(t_ref, inv_ref, o_ref):
    # Fallback for awkward dims (lcm(dim, 128) too large and dim % 128 != 0).
    # TODO(synk): this path emits masked (vst.msk) stores when dim % 128 != 0.
    o_ref[...] = t_ref[...] * inv_ref[...]


def sinusoidal_embeddings(t: jnp.ndarray, dim: int,
                          *, out_tile_bytes: int = 4 * 1024 * 1024) -> jnp.ndarray:
    """t: (...,) positions -> (..., dim) float32 sinusoidal frequency embeddings."""
    if dim % 2 != 0:
        raise ValueError(f"SinusoidalEmbeddings requires an even dim, got {dim}")

    orig_shape = tuple(t.shape)
    R = int(t.size)
    t_flat = t.reshape(R).astype(jnp.float32)

    # inv_freq with the einops repeat '... d -> ... (d r)', r=2 folded in.
    inv_freq = 1.0 / (10000.0 ** (jnp.arange(0, dim, 2, dtype=jnp.float32) / dim))
    inv_rep = jnp.repeat(inv_freq, 2)                          # (dim,)

    # ---- lane-dense packing: lanes is a multiple of 128, P positions per output row ----
    lcm = math.lcm(dim, 128)
    if lcm <= 1024:
        lanes = lcm if lcm >= 256 else lcm * (256 // lcm)      # >=256 fills v6e/v7x MXU width
        P, packed = lanes // dim, True
    elif dim % 128 == 0:
        lanes, P, packed = dim, 1, True                        # already lane-dense
    else:
        lanes, P, packed = dim, 1, False                       # rare fallback

    # ---- row tiling --------------------------------------------------------------------
    R_pad = _round_up(R, P)
    M = R_pad // P
    bytes_per_row = lanes * 4
    max_tile_m = max(128, (out_tile_bytes // bytes_per_row) // 128 * 128)
    if M <= max_tile_m:
        if M >= 256:
            # keep >= 2 grid steps so "parallel" can shard across v7x's 2 TensorCores
            tile_m = _round_up(-(-M // 2), 128)
        else:
            tile_m = M                                         # single tile; block == array
    else:
        tile_m = max_tile_m
    grid_m = pl.cdiv(M, tile_m)

    vmem_limit = min(int(2.5 * out_tile_bytes) + (6 << 20), 48 << 20)
    cparams = pltpu.CompilerParams(dimension_semantics=("parallel",),
                                   vmem_limit_bytes=vmem_limit)

    if packed:
        if R_pad != R:
            t_flat = jnp.pad(t_flat, (0, R_pad - R))
        t2d = t_flat.reshape(M, P).T                           # (P, M): contiguous DMA rows
        # Exact 3-way bf16 split: t2d == t0 + t1 + t2 bitwise (3 x 8 mantissa bits >= 24).
        t0 = t2d.astype(jnp.bfloat16)
        r1 = t2d - t0.astype(jnp.float32)
        t1 = r1.astype(jnp.bfloat16)
        t2 = (r1 - t1.astype(jnp.float32)).astype(jnp.bfloat16)
        t_split = jnp.concatenate([t0, t1, t2], axis=0)        # (3P, M) bf16

        # Block-diagonal one-hot (0/1 exact in bf16), tiled for the 3 chunks.
        sel = (jnp.arange(lanes, dtype=jnp.int32)[None, :] // dim
               == jnp.arange(P, dtype=jnp.int32)[:, None])
        w = jnp.tile(sel.astype(jnp.bfloat16), (3, 1))         # (3P, lanes)
        inv_row = jnp.tile(inv_rep, P)[None, :]                # (1, lanes) f32

        out2d = pl.pallas_call(
            _expand_kernel,
            out_shape=jax.ShapeDtypeStruct((M, lanes), jnp.float32),
            grid=(grid_m,),
            in_specs=[
                pl.BlockSpec((3 * P, tile_m), lambda i: (0, i)),
                pl.BlockSpec((3 * P, lanes), lambda i: (0, 0)),   # invariant, fetched once
                pl.BlockSpec((1, lanes), lambda i: (0, 0)),       # invariant, fetched once
            ],
            out_specs=pl.BlockSpec((tile_m, lanes), lambda i: (i, 0)),
            compiler_params=cparams,
        )(t_split, w, inv_row)

        out_flat = out2d.reshape(R_pad, dim)
        if R_pad != R:   # at most P-1 padded rows; the common case (R % P == 0) skips this
            out_flat = out_flat[:R]
    else:
        out_flat = pl.pallas_call(
            _bcast_kernel,
            out_shape=jax.ShapeDtypeStruct((M, dim), jnp.float32),
            grid=(grid_m,),
            in_specs=[
                pl.BlockSpec((tile_m, 1), lambda i: (i, 0)),
                pl.BlockSpec((1, dim), lambda i: (0, 0)),
            ],
            out_specs=pl.BlockSpec((tile_m, dim), lambda i: (i, 0)),
            compiler_params=cparams,
        )(t_flat.reshape(M, 1), inv_rep.reshape(1, dim))

    return out_flat.reshape(*orig_shape, dim)


def _reference(t: jnp.ndarray, dim: int) -> jnp.ndarray:
    inv_freq = 1.0 / (10000.0 ** (jnp.arange(0, dim, 2, dtype=jnp.float32) / dim))
    freqs = t[..., None].astype(jnp.float32) * inv_freq
    return jnp.repeat(freqs, 2, axis=-1)


if __name__ == "__main__":
    key = jax.random.PRNGKey(0)
    B, S = 2, 8
    t = jax.random.uniform(key, (B, S), dtype=jnp.float32, minval=0.0, maxval=100.0)

    # dim=32/96/128 exercise packing factors P=8/4/2 (256/384/256-lane output rows).
    for dim in (32, 96, 128):
        out = jax.block_until_ready(sinusoidal_embeddings(t, dim))
        ref = _reference(t, dim)
        assert out.shape == (B, S, dim), out.shape
        assert out.dtype == jnp.float32, out.dtype
        assert jnp.allclose(out, ref, rtol=1e-6, atol=1e-6), f"mismatch vs reference (dim={dim})"

    # Ragged case: R % P != 0 exercises the <=P-1-element pad and the tiny final slice.
    t2 = jax.random.uniform(jax.random.PRNGKey(0), (3, 5), dtype=jnp.float32,
                            minval=0.0, maxval=100.0)
    out2 = jax.block_until_ready(sinusoidal_embeddings(t2, 32))
    assert out2.shape == (3, 5, 32)
    assert jnp.allclose(out2, _reference(t2, 32), rtol=1e-6, atol=1e-6), "mismatch (ragged R)"

    print("KERNEL_OK")
</pallas_src>

<mosaic_0001>
module attributes {stable_mosaic.version = 11 : i64} {
  func.func @_expand_kernel(%arg0: i32, %arg1: memref<24x2xbf16, #tpu.memory_space<vmem>>, %arg2: memref<24x256xbf16, #tpu.memory_space<vmem>>, %arg3: memref<1x256xf32, #tpu.memory_space<vmem>>, %arg4: memref<2x256xf32, #tpu.memory_space<vmem>>) attributes {dimension_semantics = [#tpu.dimension_semantics<parallel>], iteration_bounds = array<i64: 1>, scalar_prefetch = 0 : i64, scratch_operands = 0 : i64, tpu.core_type = #tpu.core_type<tc>, window_params = [{transform_indices = @transform_0, window_bounds = array<i64: 24, 2>}, {pipeline_mode = #tpu.pipeline_mode<synchronous>, transform_indices = @transform_1, window_bounds = array<i64: 24, 256>}, {pipeline_mode = #tpu.pipeline_mode<synchronous>, transform_indices = @transform_2, window_bounds = array<i64: 1, 256>}, {transform_indices = @transform_3, window_bounds = array<i64: 2, 256>}]} {
    %c0 = arith.constant 0 : index
    %c0_0 = arith.constant 0 : index
    %0 = vector.load %arg1[%c0, %c0_0] : memref<24x2xbf16, #tpu.memory_space<vmem>>, vector<24x2xbf16>
    %c0_1 = arith.constant 0 : index
    %c0_2 = arith.constant 0 : index
    %1 = vector.load %arg2[%c0_1, %c0_2] : memref<24x256xbf16, #tpu.memory_space<vmem>>, vector<24x256xbf16>
    %cst = arith.constant dense<0.000000e+00> : vector<2x256xf32>
    %2 = tpu.matmul %0, %1, %cst {dimension_numbers = #tpu.dot_dimension_numbers<[0], [0], [1], [1], [0, 1, 1, 1], [], []>} : vector<24x2xbf16>, vector<24x256xbf16>, vector<2x256xf32> -> vector<2x256xf32>
    %c0_3 = arith.constant 0 : index
    %c0_4 = arith.constant 0 : index
    %3 = vector.load %arg3[%c0_3, %c0_4] : memref<1x256xf32, #tpu.memory_space<vmem>>, vector<1x256xf32>
    %4 = vector.broadcast %3 : vector<1x256xf32> to vector<2x256xf32>
    %5 = arith.mulf %2, %4 : vector<2x256xf32>
    %c0_5 = arith.constant 0 : index
    %c0_6 = arith.constant 0 : index
    %6 = vector.load %arg4[%c0_5, %c0_6] : memref<2x256xf32, #tpu.memory_space<vmem>>, vector<2x256xf32>
    tpu.vector_store %arg4[%c0_5, %c0_6], %5 {strides = array<i32>} : memref<2x256xf32, #tpu.memory_space<vmem>>, vector<2x256xf32>,
    return
  }
  func.func @transform_0(%arg0: i32) -> (i32, i32) {
    %c0_i32 = arith.constant 0 : i32
    %c0_i32_0 = arith.constant 0 : i32
    return %c0_i32, %arg0 : i32, i32
  }
  func.func @transform_1(%arg0: i32) -> (i32, i32) {
    %c0_i32 = arith.constant 0 : i32
    %c0_i32_0 = arith.constant 0 : i32
    %c0_i32_1 = arith.constant 0 : i32
    return %c0_i32, %c0_i32_0 : i32, i32
  }
  func.func @transform_2(%arg0: i32) -> (i32, i32) {
    %c0_i32 = arith.constant 0 : i32
    %c0_i32_0 = arith.constant 0 : i32
    %c0_i32_1 = arith.constant 0 : i32
    return %c0_i32, %c0_i32_0 : i32, i32
  }
  func.func @transform_3(%arg0: i32) -> (i32, i32) {
    %c0_i32 = arith.constant 0 : i32
    %c0_i32_0 = arith.constant 0 : i32
    return %arg0, %c0_i32 : i32, i32
  }
}

</mosaic_0001>

<bundles_post_ra>
// kernel: tpu_custom_call.1
= control target key start
LH: loop header
LB: loop body
LE: loop exit
PB: predicated region body
PF: predicated region fallthrough
CT: control target
= control target key end

     0   :  { %8 = vsyncpa [#allocation3], 0  ;;  %s297_s0 = inlined_call_operand.vmem [shape: bf16[24,2], index: 0, kind: input, shape index: {}]   ;;  %s298_s1 = inlined_call_operand.hbm [shape: bf16[24,256], index: 1, kind: input, shape index: {}]   ;;  %s299_s2 = inlined_call_operand.vmem [shape: f32[1,256], index: 2, kind: input, shape index: {}]   ;;  %s300_s3 = inlined_call_operand.hbm [shape: f32[2,256], index: 3, kind: output, shape index: {}]  }
   0x1   :  { %9 = vsyncpa [#allocation4], 0  ;;  %s239_s12 = smov [#allocation2]   ;;  %s191_s16 = scalar_lea.hbm %s298_s1, 384 }
   0x2   :  { %s17_s13 = sshll.u32 %s239_s12, 4  ;;  %p192_p0 = scmp.ne.s32.totalorder %s298_s1, %s191_s16  ;;  %s18_s13 = int_to_ptr.vmem [resolvable:$true] %s17_s13 }
   0x3   :  { %p195_p1 = scmp.lt.u32.totalorder %s191_s16, %s298_s1 }
   0x5   :  { %p197_p2 = pnand %p195_p1, %p192_p0 }
   0x7   :  { %200 = shalt.err (!%p197_p2)
}
   0x8   :  { %s201_s21 = scalar_lea.vmem %s18_s13, 384  ;;  %p206_p4 = scmp.lt.s32.totalorder %s18_s13, %s18_s13 }
   0x9   :  { %p202_p3 = scmp.ne.s32.totalorder %s18_s13, %s201_s21  ;;  %p207_p5 = scmp.lt.s32.totalorder %s201_s21, %s201_s21 }
   0xb   :  { %p208_p6 = por %p207_p5, %p206_p4 }
   0xd   :  { %p209_p7 = pnand %p208_p6, %p202_p3 }
   0xf   :  { %212 = shalt.err (!%p209_p7)
}
  0x10   :  { %s240_s22 = smov 128   ;;  %s241_s23 = smov 8  }
  0x11   :  { %23 = dma.hbm_to_vmem [thread:$0]  %s298_s1, 384, %s18_s13, [#allocation3], %s240_s22, %s240_s22, %s241_s23  }
  0x12   :  { %235 = dma.done.wait [#allocation3], 384  }
  0x13   :  { %236 = vsyncadd [#allocation3], 4294966912  ;;  %v242_v0 = vmov 0   ;;  %v184_v1 = vld [vmem:[%s297_s0] sm:$0xff]   ;;  %v185_v2 = vld [vmem:[%s297_s0 + $0x8] ss:$0 sps:$4 sm:$0xff]   ;;  %v131_v10 = vlaneseq }
  0x14   :  { %120 = vmatprep.mubr.bf16.mxu0 %v242_v0  ;;  %46 = vxpose.xlu0.c.b16.start [1/2] (short) (narrow) %v184_v1, 16  ;;  %v186_v3 = vld [vmem:[#allocation2 + $0x4] ss:$8 sps:$4 sm:$0xff]   ;;  %v188_v4 = vld [vmem:[#allocation2] ss:$8 sps:$4 sm:$0xff]   ;;  %v35_v5 = vld [vmem:[#allocation2 + $0x10] sm:$0xff] }
  0x15   :  { %vm81_vm0 = vcmask 1043456   ;;  %88 = vmatprep.subr.bf16.mxu0 %v186_v3  ;;  %v175_v6 = vcombine.high %v35_v5, %v35_v5  ;;  %v174_v7 = vcombine.low %v35_v5, %v35_v5  ;;  %vm77_vm1 = vcmask 195584   ;;  %v129_v13 = vld [vmem:[%s299_s2] sm:$0x3]  ;;  %s243_s30 = smov [#allocation5]  }
  0x16   :  { %89 = vmatpush1.bf16.msra.mxu0 %v188_v4  ;;  %v132_v11 = vshrl.u32 %v131_v10, 7  ;;  %s161_s4 = sshll.u32 %s243_s30, 4  ;;  %s162_s4 = int_to_ptr.vmem [resolvable:$true] %s161_s4 }
  0x17   :  { %176 = vmatprep.subr.msk.bf16.mxu0 %vm81_vm0, %v175_v6  ;;  %v83_v8 = vsel %vm81_vm0, %v174_v7, 0  ;;  %s213_s5 = scalar_lea.vmem %s162_s4, 64  ;;  %p218_p9 = scmp.lt.s32.totalorder %s162_s4, %s162_s4 }
  0x18   :  { %47 = vxpose.xlu0.c.b16.end [2/2] (short) (narrow) %v185_v2, 16  ;;  %v133_v12 = vsub.s32 0, %v132_v11  ;;  %v137_v14 = vsub.s32 1, %v132_v11  ;;  %p214_p8 = scmp.ne.s32.totalorder %s162_s4, %s213_s5  ;;  %p219_p10 = scmp.lt.s32.totalorder %s213_s5, %s213_s5 }
  0x1a   :  { %91 = vmatpush1.bf16.msra.mxu0 %v83_v8  ;;  %v134_v15 = vrot.slane %v129_v13, %v133_v12  ;;  %v138_v16 = vrot.slane %v129_v13, %v137_v14  ;;  %p220_p11 = por %p219_p10, %p218_p9 }
  0x1c   :  { %p221_p12 = pnand %p220_p11, %p214_p8 }
  0x7a   :  { %v54_v9 = vpop.trf.xlu0 }
  0x7b   :  { %177 = vmatmul.mubr.msk.bf16.vlgmr.msra.gmra.mrb[0].mxu0 %vm77_vm1, %v54_v9 }
 0x14e   :  { %v122_v17 = vpop.f32.mrb[0].mxu0 }
 0x14f   :  { %v141_v18 = vmul.f32 %v134_v15, %v122_v17  ;;  %v124_v19 = vpop.f32.mrb[1].mxu0 }
 0x150   :  { %v142_v20 = vmul.f32 %v138_v16, %v124_v19  ;;  %v126_v21 = vpop.f32.mrb[2].mxu0 }
 0x151   :  { %v127_v22 = vpop.f32.mrb[3].mxu0 }
 0x152   :  { %v145_v23 = vcombine.low %v141_v18, %v142_v20 }
 0x154   :  { %178 = vst.sshfl [vmem:[#allocation5] sm:$0x33 pattern:$0x76325410] %v145_v23 }
 0x155   :  { %224 = shalt.err (!%p221_p12)
}
 0x156   :  { %s225_s7 = scalar_lea.hbm %s300_s3, 64 }
 0x157   :  { %p226_p13 = scmp.ne.s32.totalorder %s300_s3, %s225_s7  ;;  %p229_p0 = scmp.lt.u32.totalorder %s225_s7, %s300_s3 }
 0x159   :  { %p231_p1 = pnand %p229_p0, %p226_p13 }
 0x15b   :  { %234 = shalt.err (!%p231_p1)
}
 0x15c   :  { %164 = dma.vmem_to_hbm [thread:$0]  %s162_s4, 64, %s300_s3, [#allocation4]  }
 0x15d   :  { %237 = dma.done.wait [#allocation4], 64  }
 0x15e   :  { %238 = vsyncadd [#allocation4], 4294967232 }
 0x15f   :  { %168 = vsyncpa [#allocation3], 1 }
 0x160   :  { %169 = vsyncpa [#allocation4], 1 }

</bundles_post_ra>
